<compile_context>
chip_gen: v7x
topology: tpu7x:2x2x1
jax: 0.10.0
libtpu: 0.0.40
codegen_flags: <defaults>
</compile_context>

<pallas_src>
import jax
import jax.numpy as jnp
from jax.experimental import pallas as pl
from jax.experimental.pallas import tpu as pltpu


def _head_kernel(w_ref, b_ref, x_ref, o_ref):
    """Pointwise channel projection on one (C_in, TILE_HW) spatial tile.

    w_ref: (C_out, C_in) f32 in SMEM  (a handful of scalars, read & broadcast)
    b_ref: (C_out,)      f32 in SMEM
    x_ref: (C_in,  TILE_HW) VMEM input tile  (lane dim = spatial, lane-dense)
    o_ref: (C_out, TILE_HW) VMEM output tile (lane-dense, unmasked stores)
    """
    c_out, c_in = w_ref.shape

    x = x_ref[...]
    if x.dtype != jnp.float32:
        x = x.astype(jnp.float32)

    rows = []
    for o in range(c_out):
        acc = x[0:1, :] * w_ref[o, 0]
        for c in range(1, c_in):
            acc = acc + x[c:c + 1, :] * w_ref[o, c]
        rows.append(acc + b_ref[o])
    out = jnp.concatenate(rows, axis=0)            # (C_out, TILE_HW)

    if out.dtype != o_ref.dtype:
        out = out.astype(o_ref.dtype)
    o_ref[...] = out


def head_forward(pixel_values, weight, bias, *, max_tile_hw=512 * 128):
    """1x1 Conv2d (pointwise channel projection) via a Pallas kernel.

    Args:
      pixel_values: (B, C_in, H, W) float32, NCHW (PyTorch convention).
      weight:       (C_out, C_in, 1, 1) float32 (PyTorch Conv2d weight).
      bias:         (C_out,) float32.
    Returns:
      (B, C_out, H, W) float32, NCHW.
    """
    B, C_in, H, W = pixel_values.shape
    C_out = weight.shape[0]
    HW = H * W

    # Free reshapes only -- no transpose, no pad, no extra HBM copies.
    x = pixel_values.reshape(B, C_in, HW)
    w = weight.reshape(C_out, C_in).astype(jnp.float32)
    b = bias.reshape(C_out).astype(jnp.float32)

    # Large lane-dense spatial tile.  If HW fits, use the full extent (block
    # shape == full dim is always layout-legal); otherwise use a 128-multiple
    # tile and let Pallas mask the tail block.
    tile_hw = HW if HW <= max_tile_hw else max_tile_hw
    num_tiles = pl.cdiv(HW, tile_hw)
    grid = (B, num_tiles)

    out = pl.pallas_call(
        _head_kernel,
        out_shape=jax.ShapeDtypeStruct((B, C_out, HW), pixel_values.dtype),
        grid_spec=pltpu.PrefetchScalarGridSpec(
            num_scalar_prefetch=0,
            grid=grid,
            in_specs=[
                # Tiny weight/bias: resident in SMEM, loaded once.
                pl.BlockSpec(memory_space=pltpu.MemorySpace.SMEM),
                pl.BlockSpec(memory_space=pltpu.MemorySpace.SMEM),
                # Activations: batch dim squeezed, spatial axis on lanes.
                pl.BlockSpec((None, C_in, tile_hw), lambda bi, si: (bi, 0, si)),
            ],
            out_specs=pl.BlockSpec((None, C_out, tile_hw),
                                   lambda bi, si: (bi, 0, si)),
        ),
        compiler_params=pltpu.CompilerParams(
            dimension_semantics=("parallel", "parallel"),
            # ~8 MiB double-buffered working set at the max tile; 32 MiB scoped
            # VMEM is safe on v5e/v6e (128 MiB phys) and v7x (64 MiB phys).
            vmem_limit_bytes=32 * 1024 * 1024,
        ),
    )(w, b, x)

    return out.reshape(B, C_out, H, W)


def flamingo_head_forward(pixel_values, head_weight, head_bias):
    """FlamingoHEAD.forward up to and including `self.head(pixel_values)`.

    The downstream `self.flamingo_model(...)` call is not reproducible from the
    given snippet (pretrained model, no definition); we return the head output.
    """
    return head_forward(pixel_values, head_weight, head_bias)


if __name__ == "__main__":
    key = jax.random.PRNGKey(0)
    k_x, k_w, k_b = jax.random.split(key, 3)

    B, C_in, H, W = 2, 4, 16, 16
    C_out = 3   # adapt to 3-channel "image" for the downstream vision encoder

    pixel_values = jax.random.normal(k_x, (B, C_in, H, W), dtype=jnp.float32)
    head_weight = (jax.random.normal(k_w, (C_out, C_in, 1, 1), dtype=jnp.float32)
                   * (1.0 / jnp.sqrt(C_in)))
    head_bias = jax.random.normal(k_b, (C_out,), dtype=jnp.float32) * 0.01

    out = flamingo_head_forward(pixel_values, head_weight, head_bias)
    out = jax.block_until_ready(out)

    # Pure-JAX reference check of the 1x1-conv semantics.
    ref = (jnp.einsum('bchw,oc->bohw', pixel_values,
                      head_weight.reshape(C_out, C_in))
           + head_bias.reshape(1, C_out, 1, 1))
    assert out.shape == (B, C_out, H, W)
    assert jnp.allclose(out, ref, atol=1e-5, rtol=1e-5)

    print("KERNEL_OK")
</pallas_src>

<mosaic_0001>
module attributes {stable_mosaic.version = 11 : i64} {
  func.func @_head_kernel(%arg0: i32, %arg1: i32, %arg2: memref<3x4xf32, #tpu.memory_space<smem>>, %arg3: memref<3xf32, #tpu.memory_space<smem>>, %arg4: memref<1x4x256xf32, #tpu.memory_space<vmem>>, %arg5: memref<1x3x256xf32, #tpu.memory_space<vmem>>) attributes {dimension_semantics = [#tpu.dimension_semantics<parallel>, #tpu.dimension_semantics<parallel>], iteration_bounds = array<i64: 2, 1>, scalar_prefetch = 0 : i64, scratch_operands = 0 : i64, tpu.core_type = #tpu.core_type<tc>, window_params = [{transform_indices = @transform_0, window_bounds = array<i64: 3, 4>}, {transform_indices = @transform_1, window_bounds = array<i64: 3>}, {transform_indices = @transform_2, window_bounds = array<i64: 1, 4, 256>}, {transform_indices = @transform_3, window_bounds = array<i64: 1, 3, 256>}]} {
    %c0 = arith.constant 0 : index
    %c0_0 = arith.constant 0 : index
    %c0_1 = arith.constant 0 : index
    %0 = vector.load %arg4[%c0, %c0_0, %c0_1] : memref<1x4x256xf32, #tpu.memory_space<vmem>>, vector<1x4x256xf32>
    %1 = vector.shape_cast %0 : vector<1x4x256xf32> to vector<4x256xf32>
    %2 = vector.extract_strided_slice %1 {offsets = [0, 0], sizes = [1, 256], strides = [1, 1]} : vector<4x256xf32> to vector<1x256xf32>
    %c0_2 = arith.constant 0 : index
    %c0_3 = arith.constant 0 : index
    %3 = memref.load %arg2[%c0_2, %c0_3] : memref<3x4xf32, #tpu.memory_space<smem>>
    %4 = vector.broadcast %3 : f32 to vector<1x256xf32>
    %5 = arith.mulf %2, %4 : vector<1x256xf32>
    %6 = vector.extract_strided_slice %1 {offsets = [1, 0], sizes = [1, 256], strides = [1, 1]} : vector<4x256xf32> to vector<1x256xf32>
    %c0_4 = arith.constant 0 : index
    %c1 = arith.constant 1 : index
    %7 = memref.load %arg2[%c0_4, %c1] : memref<3x4xf32, #tpu.memory_space<smem>>
    %8 = vector.broadcast %7 : f32 to vector<1x256xf32>
    %9 = arith.mulf %6, %8 : vector<1x256xf32>
    %10 = arith.addf %5, %9 : vector<1x256xf32>
    %11 = vector.extract_strided_slice %1 {offsets = [2, 0], sizes = [1, 256], strides = [1, 1]} : vector<4x256xf32> to vector<1x256xf32>
    %c0_5 = arith.constant 0 : index
    %c2 = arith.constant 2 : index
    %12 = memref.load %arg2[%c0_5, %c2] : memref<3x4xf32, #tpu.memory_space<smem>>
    %13 = vector.broadcast %12 : f32 to vector<1x256xf32>
    %14 = arith.mulf %11, %13 : vector<1x256xf32>
    %15 = arith.addf %10, %14 : vector<1x256xf32>
    %16 = vector.extract_strided_slice %1 {offsets = [3, 0], sizes = [1, 256], strides = [1, 1]} : vector<4x256xf32> to vector<1x256xf32>
    %c0_6 = arith.constant 0 : index
    %c3 = arith.constant 3 : index
    %17 = memref.load %arg2[%c0_6, %c3] : memref<3x4xf32, #tpu.memory_space<smem>>
    %18 = vector.broadcast %17 : f32 to vector<1x256xf32>
    %19 = arith.mulf %16, %18 : vector<1x256xf32>
    %20 = arith.addf %15, %19 : vector<1x256xf32>
    %c0_7 = arith.constant 0 : index
    %21 = memref.load %arg3[%c0_7] : memref<3xf32, #tpu.memory_space<smem>>
    %22 = vector.broadcast %21 : f32 to vector<1x256xf32>
    %23 = arith.addf %20, %22 : vector<1x256xf32>
    %24 = vector.extract_strided_slice %1 {offsets = [0, 0], sizes = [1, 256], strides = [1, 1]} : vector<4x256xf32> to vector<1x256xf32>
    %c1_8 = arith.constant 1 : index
    %c0_9 = arith.constant 0 : index
    %25 = memref.load %arg2[%c1_8, %c0_9] : memref<3x4xf32, #tpu.memory_space<smem>>
    %26 = vector.broadcast %25 : f32 to vector<1x256xf32>
    %27 = arith.mulf %24, %26 : vector<1x256xf32>
    %28 = vector.extract_strided_slice %1 {offsets = [1, 0], sizes = [1, 256], strides = [1, 1]} : vector<4x256xf32> to vector<1x256xf32>
    %c1_10 = arith.constant 1 : index
    %c1_11 = arith.constant 1 : index
    %29 = memref.load %arg2[%c1_10, %c1_11] : memref<3x4xf32, #tpu.memory_space<smem>>
    %30 = vector.broadcast %29 : f32 to vector<1x256xf32>
    %31 = arith.mulf %28, %30 : vector<1x256xf32>
    %32 = arith.addf %27, %31 : vector<1x256xf32>
    %33 = vector.extract_strided_slice %1 {offsets = [2, 0], sizes = [1, 256], strides = [1, 1]} : vector<4x256xf32> to vector<1x256xf32>
    %c1_12 = arith.constant 1 : index
    %c2_13 = arith.constant 2 : index
    %34 = memref.load %arg2[%c1_12, %c2_13] : memref<3x4xf32, #tpu.memory_space<smem>>
    %35 = vector.broadcast %34 : f32 to vector<1x256xf32>
    %36 = arith.mulf %33, %35 : vector<1x256xf32>
    %37 = arith.addf %32, %36 : vector<1x256xf32>
    %38 = vector.extract_strided_slice %1 {offsets = [3, 0], sizes = [1, 256], strides = [1, 1]} : vector<4x256xf32> to vector<1x256xf32>
    %c1_14 = arith.constant 1 : index
    %c3_15 = arith.constant 3 : index
    %39 = memref.load %arg2[%c1_14, %c3_15] : memref<3x4xf32, #tpu.memory_space<smem>>
    %40 = vector.broadcast %39 : f32 to vector<1x256xf32>
    %41 = arith.mulf %38, %40 : vector<1x256xf32>
    %42 = arith.addf %37, %41 : vector<1x256xf32>
    %c1_16 = arith.constant 1 : index
    %43 = memref.load %arg3[%c1_16] : memref<3xf32, #tpu.memory_space<smem>>
    %44 = vector.broadcast %43 : f32 to vector<1x256xf32>
    %45 = arith.addf %42, %44 : vector<1x256xf32>
    %46 = vector.extract_strided_slice %1 {offsets = [0, 0], sizes = [1, 256], strides = [1, 1]} : vector<4x256xf32> to vector<1x256xf32>
    %c2_17 = arith.constant 2 : index
    %c0_18 = arith.constant 0 : index
    %47 = memref.load %arg2[%c2_17, %c0_18] : memref<3x4xf32, #tpu.memory_space<smem>>
    %48 = vector.broadcast %47 : f32 to vector<1x256xf32>
    %49 = arith.mulf %46, %48 : vector<1x256xf32>
    %50 = vector.extract_strided_slice %1 {offsets = [1, 0], sizes = [1, 256], strides = [1, 1]} : vector<4x256xf32> to vector<1x256xf32>
    %c2_19 = arith.constant 2 : index
    %c1_20 = arith.constant 1 : index
    %51 = memref.load %arg2[%c2_19, %c1_20] : memref<3x4xf32, #tpu.memory_space<smem>>
    %52 = vector.broadcast %51 : f32 to vector<1x256xf32>
    %53 = arith.mulf %50, %52 : vector<1x256xf32>
    %54 = arith.addf %49, %53 : vector<1x256xf32>
    %55 = vector.extract_strided_slice %1 {offsets = [2, 0], sizes = [1, 256], strides = [1, 1]} : vector<4x256xf32> to vector<1x256xf32>
    %c2_21 = arith.constant 2 : index
    %c2_22 = arith.constant 2 : index
    %56 = memref.load %arg2[%c2_21, %c2_22] : memref<3x4xf32, #tpu.memory_space<smem>>
    %57 = vector.broadcast %56 : f32 to vector<1x256xf32>
    %58 = arith.mulf %55, %57 : vector<1x256xf32>
    %59 = arith.addf %54, %58 : vector<1x256xf32>
    %60 = vector.extract_strided_slice %1 {offsets = [3, 0], sizes = [1, 256], strides = [1, 1]} : vector<4x256xf32> to vector<1x256xf32>
    %c2_23 = arith.constant 2 : index
    %c3_24 = arith.constant 3 : index
    %61 = memref.load %arg2[%c2_23, %c3_24] : memref<3x4xf32, #tpu.memory_space<smem>>
    %62 = vector.broadcast %61 : f32 to vector<1x256xf32>
    %63 = arith.mulf %60, %62 : vector<1x256xf32>
    %64 = arith.addf %59, %63 : vector<1x256xf32>
    %c2_25 = arith.constant 2 : index
    %65 = memref.load %arg3[%c2_25] : memref<3xf32, #tpu.memory_space<smem>>
    %66 = vector.broadcast %65 : f32 to vector<1x256xf32>
    %67 = arith.addf %64, %66 : vector<1x256xf32>
    %68 = tpu.concatenate %23, %45, %67 in 0 : vector<1x256xf32>, vector<1x256xf32>, vector<1x256xf32> -> vector<3x256xf32>
    %c0_26 = arith.constant 0 : index
    %c0_27 = arith.constant 0 : index
    %c0_28 = arith.constant 0 : index
    %69 = vector.load %arg5[%c0_26, %c0_27, %c0_28] : memref<1x3x256xf32, #tpu.memory_space<vmem>>, vector<1x3x256xf32>
    %70 = vector.shape_cast %69 : vector<1x3x256xf32> to vector<3x256xf32>
    %71 = vector.shape_cast %68 : vector<3x256xf32> to vector<1x3x256xf32>
    tpu.vector_store %arg5[%c0_26, %c0_27, %c0_28], %71 {strides = array<i32>} : memref<1x3x256xf32, #tpu.memory_space<vmem>>, vector<1x3x256xf32>,
    return
  }
  func.func @transform_0(%arg0: i32, %arg1: i32) -> (i32, i32) {
    %c0_i32 = arith.constant 0 : i32
    %c0_i32_0 = arith.constant 0 : i32
    %c0_i32_1 = arith.constant 0 : i32
    return %c0_i32, %c0_i32_0 : i32, i32
  }
  func.func @transform_1(%arg0: i32, %arg1: i32) -> i32 {
    %c0_i32 = arith.constant 0 : i32
    %c0_i32_0 = arith.constant 0 : i32
    return %c0_i32 : i32
  }
  func.func @transform_2(%arg0: i32, %arg1: i32) -> (i32, i32, i32) {
    %c0_i32 = arith.constant 0 : i32
    %c0_i32_0 = arith.constant 0 : i32
    return %arg0, %c0_i32, %arg1 : i32, i32, i32
  }
  func.func @transform_3(%arg0: i32, %arg1: i32) -> (i32, i32, i32) {
    %c0_i32 = arith.constant 0 : i32
    %c0_i32_0 = arith.constant 0 : i32
    return %arg0, %c0_i32, %arg1 : i32, i32, i32
  }
}

</mosaic_0001>

<bundles_post_ra>
// kernel: tpu_custom_call.1
= control target key start
LH: loop header
LB: loop body
LE: loop exit
PB: predicated region body
PF: predicated region fallthrough
CT: control target
= control target key end

     0   :  { %8 = vsyncpa [#allocation4], 0  ;;  %s939_s0 = inlined_call_operand.hbm [shape: f32[3,4], index: 0, kind: input, shape index: {}]   ;;  %s940_s1 = inlined_call_operand.vmem [shape: f32[3], index: 1, kind: input, shape index: {}]   ;;  %s941_s2 = inlined_call_operand.hbm [shape: f32[2,4,256], index: 2, kind: input, shape index: {}]   ;;  %s942_s3 = inlined_call_operand.vmem [shape: f32[2,3,256], index: 3, kind: output, shape index: {}]  }
   0x1   :  { %9 = vsyncpa [#allocation5], 0 }
   0x2   :  { %10 = vsyncpa [#allocation3], 0 }
   0x3   :  { %12 = vsyncpa [#allocation3 + $0x1], 0  ;;  %s754_s12 = smov 0   ;;  %s756_s13 = smov 0  }
   0x4   :  { %s758_s14 = smov 0   ;;  %s760_s15 = smov 0  }
   0x5   :  { %s762_s16 = smov 0   ;;  %s764_s17 = smov 0  }
   0x6 LB: > { %s496_s18 = sadd.s32 4294967295, %s729_s17   ;;  %p94_p0 = scmp.ne.s32.totalorder %s713_s13, %s709_s12  ;;  %s729_s17 = sphi %s764_s17, %s18_s17   ;;  %s725_s16 = sphi %s762_s16, %s958_s16   ;;  %s721_s15 = sphi %s760_s15, %s957_s15   ;;  %s717_s14 = sphi %s758_s14, %s956_s14   ;;  %s713_s13 = sphi %s756_s13, %s955_s13   ;;  %s709_s12 = sphi %s754_s12, %s954_s12  }
   0x7   : > { %p784_p1 = scmp.eq.s32.totalorder %s496_s18, 0  ;;  %p498_p2 = scmp.ge.s32.totalorder %s729_s17, 1 }
   0x8   : > { %p133_p3 = scmp.lt.s32.totalorder %s729_s17, 3  ;;  %s155_s24 = sshll.u32 %s940_s1, 4  ;;  %s156_s24 = int_to_ptr.vmem [resolvable:$true] %s155_s24 }
   0x9   : > { %s946_s19 = scalar_select %p784_p1, 1, 0 }
   0xa   : > { %p792_p4 = por %p784_p1, %p94_p0  ;;  %p796_p5 = pnand %p498_p2, %p133_p3 }
   0xb   : > { %s30_s26 = sadd.s32 1, %s725_s16  ;;  %s613_s30 = scalar_lea.hbm %s939_s0, 64 }
   0xc   : > { %s947_s20 = scalar_select %p792_p4, 1, 0 }
   0xd   : > { %p547_p6 = pneg %p796_p5  ;;  %p812_p8 = scmp.ge.s32.totalorder %s30_s26, 2 }
   0xe   : > { %p614_p9 = scmp.ne.s32.totalorder %s939_s0, %s613_s30  ;;  %p620_p13 = scmp.lt.u32.totalorder %s613_s30, %s939_s0 }
   0xf   : > { %p807_p7 = pnand %p547_p6, %p784_p1 }
  0x11   : > { %p615_p10 = pneg %p807_p7 }
  0x13   : > { %p616_p11 = pnand %p615_p10, %p614_p9 }
  0x15   : > { %p617_p12 = pneg %p616_p11 }
  0x17   : > { %p622_p0 = pnand %p620_p13, %p617_p12 }
  0x19   : > { %625 = shalt.err (!%p622_p0)
}
  0x1a   : > { %s731_s8 = smov [#allocation2]   ;;  %s626_s11 = scalar_lea.vmem %s156_s24, 16 }
  0x1b   : > { %550 = dma.hbm_to_smem (!%p807_p7), %s939_s0, 64, %s731_s8, [#allocation4]  }
  0x1c   : > { %p627_p2 = scmp.ne.s32.totalorder %s156_s24, %s626_s11  ;;  %p634_p4 = scmp.lt.s32.totalorder %s156_s24, %s156_s24 }
  0x1d   : > { %p635_p9 = scmp.lt.s32.totalorder %s626_s11, %s626_s11 }
  0x1e   : > { %p629_p3 = pnand %p627_p2, %p615_p10 }
  0x1f   : > { %p636_p11 = por %p635_p9, %p634_p4 }
  0x20   : > { %p630_p6 = pneg %p629_p3 }
  0x22   : > { %p637_p1 = pnand %p636_p11, %p630_p6 }
  0x24   : > { %640 = shalt.err (!%p637_p1)
}
  0x25   : > { %s732_s12 = smov [#allocation6]   ;;  %s960_s26 = smov (%p812_p8, %s30_s26), 0 }
  0x26   : > { %553 = dma.vmem_to_smem (!%p807_p7), %s156_s24, 16, %s732_s12, [#allocation5]  }
  0x27   : > { %s81_s18 = sadd.s32 1, %s717_s14  ;;  %p88_p1 = scmp.ne.s32.totalorder %s717_s14, %s713_s13 }
  0x28   : > { %s76_s22 = ssub.s32 %s725_s16, %s960_s26  ;;  %p89_p4 = scmp.eq.s32.totalorder %s729_s17, 0 }
  0x29   : > { %p79_p10 = scmp.eq.s32.totalorder %s76_s22, 0  ;;  %p560_p12 = scmp.lt.s32.totalorder %s729_s17, 2 }
  0x2a   : > { %p90_p13 = por %p89_p4, %p88_p1  ;;  %s166_s23 = sand.u32 1, %s717_s14  }
  0x2b   : > { %s847_s25 = scalar_select %p79_p10, %s717_s14, %s81_s18  }
  0x2c   : > { %s502_s28 = sshll.u32 %s166_s23, 3  ;;  %s535_s29 = sshll.u32 %s725_s16, 7 }
  0x2d   : > { %s853_s24 = scalar_lea.hbm %s941_s2, %s535_s29  ;;  %s170_s27 = scalar_lea.vmem [#allocation7], %s502_s28 }
  0x2e   : > { %s180_s5 = sshll.u32 %s170_s27, 4  ;;  %p857_p7 = pnand %p560_p12, %p90_p13  ;;  %s855_s5 = int_to_ptr.vmem [resolvable:$true] %s180_s5 }
  0x2f   : > { %s167_s7 = scalar_lea.sflag [#allocation3], %s166_s23  ;;  %s641_s8 = scalar_lea.hbm %s853_s24, 128 }
  0x30   : > { %p642_p8 = scmp.ne.s32.totalorder %s853_s24, %s641_s8  ;;  %p643_p0 = pneg %p857_p7 }
  0x31   : > { %s646_s11 = scalar_lea.hbm %s941_s2, 256  ;;  %p647_p6 = scmp.lt.u32.totalorder %s853_s24, %s941_s2 }
  0x32   : > { %p644_p2 = pnand %p643_p0, %p642_p8  ;;  %p648_p9 = scmp.lt.u32.totalorder %s646_s11, %s641_s8 }
  0x33   : > { %p650_p1 = scmp.lt.u32.totalorder %s641_s8, %s853_s24 }
  0x34   : > { %p645_p3 = pneg %p644_p2  ;;  %p649_p11 = por %p648_p9, %p647_p6 }
  0x36   : > { %p651_p4 = por %p650_p1, %p649_p11 }
  0x38   : > { %p652_p10 = pnand %p651_p4, %p645_p3 }
  0x3a   : > { %655 = shalt.err (!%p652_p10)
}
  0x3b   : > { %s656_s22 = scalar_lea.vmem %s855_s5, 128  ;;  %s733_s23 = smov [#allocation7]  }
  0x3c   : > { %p657_p12 = scmp.ne.s32.totalorder %s855_s5, %s656_s22  ;;  %s661_s28 = sshll.u32 %s733_s23, 4  ;;  %s662_s28 = int_to_ptr.vmem [resolvable:$false] %s661_s28 }
  0x3d   : > { %s663_s29 = scalar_lea.vmem %s662_s28, 256  ;;  %p664_p2 = scmp.lt.s32.totalorder %s855_s5, %s662_s28 }
  0x3e   : > { %p659_p13 = pnand %p657_p12, %p643_p0  ;;  %p665_p6 = scmp.lt.s32.totalorder %s663_s29, %s656_s22 }
  0x40   : > { %p660_p8 = pneg %p659_p13  ;;  %p666_p9 = por %p665_p6, %p664_p2 }
  0x42   : > { %p667_p11 = pnand %p666_p9, %p660_p8 }
  0x44   : > { %670 = shalt.err (!%p667_p11)
}
  0x45   : > { %557 = dma.hbm_to_vmem [thread:$0]  (!%p857_p7), %s853_s24, 128, %s855_s5, %s167_s7  }
  0x46   : > { %189 = sbr.rel (%p796_p5) target bundleno = 118 (0x76), region = 32  ;;  %p952_p0 = scmp.ne.s32.totalorder (!%p796_p5), %s946_s19, 0 }
  0x4d   : > { %696 = dma.done.wait (%p952_p0), [#allocation4], 64  }
  0x4e   : > { %698 = vsyncadd (%p952_p0), [#allocation4], 4294967232 }
  0x4f   : > { %700 = dma.done.wait (%p952_p0), [#allocation5], 16  }
  0x50   : > { %702 = vsyncadd (%p952_p0), [#allocation5], 4294967280  ;;  %s199_s30 = sand.u32 1, %s713_s13   ;;  %p953_p7 = scmp.ne.s32.totalorder %s947_s20, 0 }
  0x51   : > { %s508_s4 = sshll.u32 %s199_s30, 3  ;;  %s200_s24 = scalar_lea.sflag [#allocation3], %s199_s30 }
  0x52   : > { %s203_s27 = scalar_lea.vmem [#allocation7], %s508_s4 }
  0x53   : > { %704 = dma.done.wait (%p953_p7), %s200_s24, 128  }
  0x54   : > { %706 = vsyncadd (%p953_p7), %s200_s24, 4294967168 }
  0x55   : > { %208 = sfence }
  0x56   : > { %s243_s21 = sld [smem:[#allocation2]]  ;;  %s511_s5 = sld [smem:[#allocation2 + $0x1]]  ;;  %v242_v0 = vld [vmem:[%s203_s27] sm:$0xff]  ;;  %v334_v4 = vlaneseq  ;;  %vm366_vm0 = vcmask 1040384   ;;  %vm369_vm1 = vcmask 1041408  }
  0x57   : > { %s513_s6 = sld [smem:[#allocation2 + $0x2]]  ;;  %s515_s7 = sld [smem:[#allocation2 + $0x3]] }
  0x58   : > { %s517_s8 = sld [smem:[#allocation2 + $0x80]]  ;;  %s518_s9 = sld [smem:[#allocation2 + $0x81]]  ;;  %v335_v15 = vshrl.u32 %v334_v4, 7 }
  0x59   : > { %s901_s19 = sld [smem:[#allocation6]]  ;;  %s520_s10 = sld [smem:[#allocation2 + $0x82]] }
  0x5a   : > { %s522_s11 = sld [smem:[#allocation2 + $0x83]]  ;;  %s525_s12 = sld [smem:[#allocation2 + $0x100]]  ;;  %v336_v40 = vsub.s32 0, %v335_v15  ;;  %v340_v44 = vsub.s32 4, %v335_v15 }
  0x5b   : > { %s903_s20 = sld [smem:[#allocation2 + $0x101]]  ;;  %s905_s18 = sld [smem:[#allocation2 + $0x102]] }
  0x5c   : > { %v244_v1 = vstv %s243_s21  ;;  %v247_v2 = vstv %s511_s5  ;;  %s907_s22 = sld [smem:[#allocation2 + $0x103]]  ;;  %s909_s23 = sld [smem:[#allocation6 + $0x1]] }
  0x5d   : > { %v255_v3 = vstv %s513_s6  ;;  %v245_v5 = vmul.f32 %v244_v1, %v242_v0  ;;  %v248_v6 = vmul.f32 %v247_v2, %v242_v0  ;;  %v263_v8 = vstv %s515_s7  ;;  %s532_s28 = sld [smem:[#allocation6 + $0x2]]  ;;  %p233_p5 = scmp.lt.s32.totalorder %s721_s15, 1 }
  0x5e   : > { %v256_v7 = vmul.f32 %v255_v3, %v242_v0  ;;  %v264_v11 = vmul.f32 %v263_v8, %v242_v0  ;;  %v274_v12 = vstv %s517_s8  ;;  %v277_v14 = vstv %s518_s9 }
  0x5f   : > { %v512_v9 = vrot.slane %v248_v6, 9  ;;  %v275_v13 = vmul.f32 %v274_v12, %v242_v0  ;;  %v278_v18 = vmul.f32 %v277_v14, %v242_v0  ;;  %v285_v19 = vstv %s520_s10  ;;  %s962_s15 = smov (!%p233_p5, %s721_s15), 1 }
  0x60   : > { %v514_v10 = vrot.slane %v256_v7, 10  ;;  %v516_v17 = vrot.slane %v264_v11, 11  ;;  %v271_v20 = vstv %s901_s19  ;;  %v286_v21 = vmul.f32 %v285_v19, %v242_v0  ;;  %s536_s29 = sshll.u32 %s962_s15, 3 }
  0x61   : > { %v253_v16 = vadd.f32 %v512_v9, %v245_v5  ;;  %v293_v22 = vstv %s522_s11  ;;  %v304_v23 = vstv %s525_s12  ;;  %v519_v25 = vrot.slane %v278_v18, 9  ;;  %s240_s24 = scalar_lea.vmem %s942_s3, %s536_s29 }
  0x62   : > { %v294_v26 = vmul.f32 %v293_v22, %v242_v0  ;;  %v305_v27 = vmul.f32 %v304_v23, %v242_v0  ;;  %v521_v28 = vrot.slane %v286_v21, 10  ;;  %v307_v29 = vstv %s903_s20 }
  0x63   : > { %v261_v24 = vadd.f32 %v514_v10, %v253_v16  ;;  %v315_v30 = vstv %s905_s18  ;;  %v323_v31 = vstv %s907_s22  ;;  %v283_v33 = vadd.f32 %v519_v25, %v275_v13 }
  0x64   : > { %v523_v34 = vrot.slane %v294_v26, 11  ;;  %v308_v35 = vmul.f32 %v307_v29, %v242_v0  ;;  %v316_v36 = vmul.f32 %v315_v30, %v242_v0  ;;  %v324_v37 = vmul.f32 %v323_v31, %v242_v0 }
  0x65   : > { %v269_v32 = vadd.f32 %v516_v17, %v261_v24  ;;  %v291_v38 = vadd.f32 %v521_v28, %v283_v33  ;;  %v301_v42 = vstv %s909_s23  ;;  %v331_v50 = vstv %s532_s28 }
  0x66   : > { %v527_v39 = vrot.slane %v308_v35, 9  ;;  %v529_v43 = vrot.slane %v316_v36, 10  ;;  %v531_v47 = vrot.slane %v324_v37, 11 }
  0x67   : > { %v272_v41 = vadd.f32 %v271_v20, %v269_v32  ;;  %v299_v45 = vadd.f32 %v523_v34, %v291_v38 }
  0x68   : > { %v313_v46 = vadd.f32 %v527_v39, %v305_v27 }
  0x69   : > { %v302_v48 = vadd.f32 %v301_v42, %v299_v45  ;;  %v337_v51 = vrot.slane %v272_v41, %v336_v40  ;;  %v341_v52 = vrot.slane %v272_v41, %v340_v44 }
  0x6a   : > { %v321_v49 = vadd.f32 %v529_v43, %v313_v46 }
  0x6b   : > { %v348_v54 = vrot.slane %v302_v48, %v336_v40  ;;  %v352_v55 = vrot.slane %v302_v48, %v340_v44 }
  0x6c   : > { %v329_v53 = vadd.f32 %v531_v47, %v321_v49 }
  0x6d   : > { %v367_v57 = vsel %vm366_vm0, %v337_v51, %v348_v54  ;;  %v368_v58 = vsel %vm366_vm0, %v341_v52, %v352_v55 }
  0x6e   : > { %v332_v56 = vadd.f32 %v331_v50, %v329_v53 }
  0x70   : > { %v359_v59 = vrot.slane %v332_v56, %v336_v40  ;;  %v363_v60 = vrot.slane %v332_v56, %v340_v44 }
  0x72   : > { %v370_v61 = vsel %vm369_vm1, %v367_v57, %v359_v59  ;;  %v371_v62 = vsel %vm369_vm1, %v368_v58, %v363_v60 }
  0x73   : > { %v374_v63 = vcombine.low %v370_v61, %v371_v62 }
  0x75   : > { %376 = vst [vmem:[%s240_s24] sm:$0x77] %v374_v63 }
  0x76 PF: > { %s18_s17 = sadd.s32 1, %s729_s17   ;;  %s954_s12 = smov %s713_s13 }
  0x77   : > { %p15_p3 = scmp.ge.s32.totalorder %s18_s17, 4   ;;  %s955_s13 = smov %s717_s14 }
  0x78   : > { %s956_s14 = smov %s847_s25  ;;  %s957_s15 = smov %s725_s16 }
  0x79   : > { %s958_s16 = smov %s960_s26  ;;  %17 = sbr.rel (!%p15_p3) target bundleno = 6 (0x6), region = 82 }
  0x80   :  { %407 = vsyncpa [#allocation3], 1 }
  0x81   :  { %409 = vsyncpa [#allocation3 + $0x1], 1 }
  0x82   :  { %410 = vsyncpa [#allocation4], 1 }
  0x83   :  { %412 = vsyncpa [#allocation4 + $0x1], 1 }
  0x84   :  { %413 = vsyncpa [#allocation5], 1 }
  0x85   :  { %415 = vsyncpa [#allocation5 + $0x1], 1 }

</bundles_post_ra>
